<compile_context>
chip_gen: v5e
topology: v5e:2x2
jax: 0.10.0
libtpu: 0.0.40
codegen_flags: <defaults>
</compile_context>

<pallas_src>
import functools

import jax
import jax.numpy as jnp
from jax.experimental import pallas as pl
from jax.experimental.pallas import tpu as pltpu

KSIZE = 3  # Conv1d kernel_size


def concat_conv_kernel(x2_ref, x1_ref, wv_ref, wcb_ref, o_ref):
    """x2_ref/x1_ref: (blk_r, W) folded input blocks (VMEM), native dtype.
       wv_ref: (4, W) f32 per-lane tap weights with boundary masking baked in
               (rows: x2-left, x1-left, x2-right, x1-right).
       wcb_ref: (3,) f32 SMEM scalars: [w2_center, w1_center, bias].
       o_ref: (blk_r, W) output block (VMEM), input dtype."""
    # In-kernel cast (VPU op hidden under DMA); accumulate in f32 on every
    # generation (v5e has no bf16 VALU).
    x2 = x2_ref[...].astype(jnp.float32)
    x1 = x1_ref[...].astype(jnp.float32)
    width = x2.shape[1]

    w2c, w1c, bias = wcb_ref[0], wcb_ref[1], wcb_ref[2]

    # Center tap, bias folded in.
    acc = x2 * w2c + (x1 * w1c + bias)

    # Left tap: x[t-1] == roll(x, +1)[t].  The first element of every folded
    # segment (and the circular wrap at the row edge) is zeroed via the weight
    # vector, emulating Conv1d zero padding — no per-element mask math here.
    acc = acc + pltpu.roll(x2, 1, axis=1) * wv_ref[0:1, :] \
              + pltpu.roll(x1, 1, axis=1) * wv_ref[1:2, :]

    # Right tap: x[t+1] == roll(x, -1)[t], expressed as roll(width-1) to keep the
    # shift nonnegative.  Last element of every segment zeroed via the weights.
    acc = acc + pltpu.roll(x2, width - 1, axis=1) * wv_ref[2:3, :] \
              + pltpu.roll(x1, width - 1, axis=1) * wv_ref[3:4, :]

    o_ref[...] = acc.astype(o_ref.dtype)


def _pick_fold(n, l, max_width):
    """Largest divisor g of n with g*l <= max_width, preferring (g*l) % 128 == 0
    so the fold is a zero-copy reshape onto a lane-dense layout."""
    best, best_dense = 1, (l % 128 == 0)
    gmax = min(n, max(1, max_width // l))
    for g in range(1, gmax + 1):
        if n % g:
            continue
        dense = (g * l) % 128 == 0
        if (dense, g) > (best_dense, best):
            best, best_dense = g, dense
    return best


def _pick_block_rows(r, w, target_bytes=4 * 1024 * 1024):
    """Rows per block so one f32-equivalent buffer is ~target_bytes.  Sized with
    4 B/elem regardless of input dtype so in-kernel f32 temporaries stay bounded.
    Guarantees >= 2 roughly-even blocks whenever r allows, so ("parallel",) can
    shard the grid across v7x's 2 TensorCores (no effect on v5e/v6e)."""
    rows = max(8, (target_bytes // (w * 4)) // 8 * 8)
    if r > 8 and rows * 2 >= r:
        # Would be <=2 (possibly ragged) blocks: rebalance into exactly 2.
        rows = ((r + 1) // 2 + 7) // 8 * 8
    return min(rows, r)


@functools.partial(jax.jit, static_argnames=("max_width",))
def concat_conv(x1, x2, weight, bias, *, max_width=4096):
    """x1, x2: (N, 1, L) float (NCL, like PyTorch).
       weight: (1, 2, 3) float32 (out_ch, in_ch, k) — PyTorch Conv1d layout.
       bias:   (1,)      float32.
       Returns (N, 1, L) in x1's dtype = Conv1d(cat([x2, x1], dim=1))."""
    n, _, l = x1.shape
    out_dtype = x1.dtype
    a1 = x1[:, 0, :]  # (N, L), native dtype (no wrapper-side upcast pass)
    a2 = x2[:, 0, :]  # (N, L)

    # Fold batch rows into lanes: (N, L) -> (N//g, g*L).  Pure reshape, no copy.
    g = _pick_fold(n, l, max_width)
    r, w0 = n // g, g * l
    a1 = a1.reshape(r, w0)
    a2 = a2.reshape(r, w0)

    # Lane width multiple of 128 for clean (8,128) vreg tiling / lane rotates.
    w = max(128, ((w0 + 127) // 128) * 128)
    if w != w0:
        a1 = jnp.pad(a1, ((0, 0), (0, w - w0)))
        a2 = jnp.pad(a2, ((0, 0), (0, w - w0)))

    blk_r = _pick_block_rows(r, w)
    grid = (pl.cdiv(r, blk_r),)
    # NOTE: a ragged last block (r % blk_r != 0) relies on Pallas OOB-block
    # semantics (garbage reads, masked writes).  Safe here because rows are
    # fully independent (rolls are lane-axis only — no cross-row reads).

    # Per-lane tap-weight vectors with the zero-padding boundary mask baked in.
    wt = weight[0].astype(jnp.float32)            # (2, 3): row 0 -> x2, row 1 -> x1
    pos = jnp.arange(w, dtype=jnp.int32) % l      # tiny (W,) op, once per call
    not_first = (pos != 0).astype(jnp.float32)
    not_last = (pos != (l - 1)).astype(jnp.float32)
    wvec = jnp.stack([
        not_first * wt[0, 0],   # x2, left tap  (zeroed at segment starts)
        not_first * wt[1, 0],   # x1, left tap
        not_last * wt[0, 2],    # x2, right tap (zeroed at segment ends)
        not_last * wt[1, 2],    # x1, right tap
    ], axis=0)                                    # (4, W) f32
    wcb = jnp.stack([wt[0, 1], wt[1, 1], bias.astype(jnp.float32)[0]])  # (3,)

    in_bytes = jnp.dtype(x1.dtype).itemsize
    out_bytes = jnp.dtype(out_dtype).itemsize

    out = pl.pallas_call(
        concat_conv_kernel,
        out_shape=jax.ShapeDtypeStruct((r, w), out_dtype),
        grid=grid,
        in_specs=[
            pl.BlockSpec((blk_r, w), lambda i: (i, 0)),          # x2 (cat channel 0)
            pl.BlockSpec((blk_r, w), lambda i: (i, 0)),          # x1 (cat channel 1)
            pl.BlockSpec((4, w), lambda i: (0, 0)),              # masked tap weights
            pl.BlockSpec(memory_space=pltpu.MemorySpace.SMEM),   # center/bias scalars
        ],
        out_specs=pl.BlockSpec((blk_r, w), lambda i: (i, 0)),
        compiler_params=pltpu.CompilerParams(
            dimension_semantics=("parallel",),      # rows independent; v7x 2-TC shard
            vmem_limit_bytes=48 * 1024 * 1024,      # <= 64 MiB physical on v7x
        ),
        cost_estimate=pl.CostEstimate(
            flops=13 * n * l, transcendentals=0,
            bytes_accessed=(2 * in_bytes + out_bytes) * n * l),
    )(a2, a1, wvec, wcb)

    if w != w0:
        out = out[:, :w0]
    return out.reshape(n, l)[:, None, :]


def _reference(x1, x2, weight, bias):
    """Pure-JAX reference matching torch: cat((x2, x1), dim=1) -> Conv1d(2,1,3,pad=1)."""
    x = jnp.concatenate([x2, x1], axis=1)  # (N, 2, L)
    out = jax.lax.conv_general_dilated(
        x.astype(jnp.float32), weight.astype(jnp.float32),
        window_strides=(1,), padding=((1, 1),),
        dimension_numbers=("NCH", "OIH", "NCH"))
    return out + bias[None, :, None]


if __name__ == "__main__":
    key = jax.random.PRNGKey(0)
    k_x1, k_x2, k_w, k_b = jax.random.split(key, 4)

    N, L = 2, 16
    x1 = jax.random.normal(k_x1, (N, 1, L), dtype=jnp.float32)
    x2 = jax.random.normal(k_x2, (N, 1, L), dtype=jnp.float32)

    # Deterministic Conv1d parameter init (PyTorch default: U(-sqrt(k), sqrt(k)),
    # k = 1/(in_ch*ksize)).
    bound = (1.0 / (2 * KSIZE)) ** 0.5
    weight = jax.random.uniform(k_w, (1, 2, KSIZE), jnp.float32, -bound, bound)
    bias = jax.random.uniform(k_b, (1,), jnp.float32, -bound, bound)

    out = jax.block_until_ready(concat_conv(x1, x2, weight, bias))

    ref = _reference(x1, x2, weight, bias)
    assert out.shape == (N, 1, L), out.shape
    assert jnp.allclose(out, ref, atol=1e-5, rtol=1e-5), "mismatch vs reference"
    print("KERNEL_OK")
</pallas_src>

<mosaic_0001>
module attributes {stable_mosaic.version = 11 : i64} {
  func.func @concat_conv_kernel(%arg0: i32, %arg1: memref<1x128xf32, #tpu.memory_space<vmem>>, %arg2: memref<1x128xf32, #tpu.memory_space<vmem>>, %arg3: memref<4x128xf32, #tpu.memory_space<vmem>>, %arg4: memref<3xf32, #tpu.memory_space<smem>>, %arg5: memref<1x128xf32, #tpu.memory_space<vmem>>) attributes {dimension_semantics = [#tpu.dimension_semantics<parallel>], iteration_bounds = array<i64: 1>, scalar_prefetch = 0 : i64, scratch_operands = 0 : i64, tpu.core_type = #tpu.core_type<tc>, window_params = [{transform_indices = @transform_0, window_bounds = array<i64: 1, 128>}, {transform_indices = @transform_1, window_bounds = array<i64: 1, 128>}, {pipeline_mode = #tpu.pipeline_mode<synchronous>, transform_indices = @transform_2, window_bounds = array<i64: 4, 128>}, {transform_indices = @transform_3, window_bounds = array<i64: 3>}, {transform_indices = @transform_4, window_bounds = array<i64: 1, 128>}]} {
    %c0 = arith.constant 0 : index
    %c0_0 = arith.constant 0 : index
    %0 = vector.load %arg1[%c0, %c0_0] : memref<1x128xf32, #tpu.memory_space<vmem>>, vector<1x128xf32>
    %c0_1 = arith.constant 0 : index
    %c0_2 = arith.constant 0 : index
    %1 = vector.load %arg2[%c0_1, %c0_2] : memref<1x128xf32, #tpu.memory_space<vmem>>, vector<1x128xf32>
    %c0_3 = arith.constant 0 : index
    %2 = memref.load %arg4[%c0_3] : memref<3xf32, #tpu.memory_space<smem>>
    %c1 = arith.constant 1 : index
    %3 = memref.load %arg4[%c1] : memref<3xf32, #tpu.memory_space<smem>>
    %c2 = arith.constant 2 : index
    %4 = memref.load %arg4[%c2] : memref<3xf32, #tpu.memory_space<smem>>
    %5 = vector.broadcast %2 : f32 to vector<1x128xf32>
    %6 = arith.mulf %0, %5 : vector<1x128xf32>
    %7 = vector.broadcast %3 : f32 to vector<1x128xf32>
    %8 = arith.mulf %1, %7 : vector<1x128xf32>
    %9 = vector.broadcast %4 : f32 to vector<1x128xf32>
    %10 = arith.addf %8, %9 : vector<1x128xf32>
    %11 = arith.addf %6, %10 : vector<1x128xf32>
    %c1_i32 = arith.constant 1 : i32
    %12 = tpu.dynamic_rotate %0 by %c1_i32 dim 1 : vector<1x128xf32>, i32 -> vector<1x128xf32>
    %c0_4 = arith.constant 0 : index
    %c0_5 = arith.constant 0 : index
    %13 = vector.load %arg3[%c0_4, %c0_5] : memref<4x128xf32, #tpu.memory_space<vmem>>, vector<1x128xf32>
    %14 = arith.mulf %12, %13 : vector<1x128xf32>
    %15 = arith.addf %11, %14 : vector<1x128xf32>
    %c1_i32_6 = arith.constant 1 : i32
    %16 = tpu.dynamic_rotate %1 by %c1_i32_6 dim 1 : vector<1x128xf32>, i32 -> vector<1x128xf32>
    %c1_7 = arith.constant 1 : index
    %c0_8 = arith.constant 0 : index
    %17 = vector.load %arg3[%c1_7, %c0_8] : memref<4x128xf32, #tpu.memory_space<vmem>>, vector<1x128xf32>
    %18 = arith.mulf %16, %17 : vector<1x128xf32>
    %19 = arith.addf %15, %18 : vector<1x128xf32>
    %c127_i32 = arith.constant 127 : i32
    %20 = tpu.dynamic_rotate %0 by %c127_i32 dim 1 : vector<1x128xf32>, i32 -> vector<1x128xf32>
    %c2_9 = arith.constant 2 : index
    %c0_10 = arith.constant 0 : index
    %21 = vector.load %arg3[%c2_9, %c0_10] : memref<4x128xf32, #tpu.memory_space<vmem>>, vector<1x128xf32>
    %22 = arith.mulf %20, %21 : vector<1x128xf32>
    %23 = arith.addf %19, %22 : vector<1x128xf32>
    %c127_i32_11 = arith.constant 127 : i32
    %24 = tpu.dynamic_rotate %1 by %c127_i32_11 dim 1 : vector<1x128xf32>, i32 -> vector<1x128xf32>
    %c3 = arith.constant 3 : index
    %c0_12 = arith.constant 0 : index
    %25 = vector.load %arg3[%c3, %c0_12] : memref<4x128xf32, #tpu.memory_space<vmem>>, vector<1x128xf32>
    %26 = arith.mulf %24, %25 : vector<1x128xf32>
    %27 = arith.addf %23, %26 : vector<1x128xf32>
    %c0_13 = arith.constant 0 : index
    %c0_14 = arith.constant 0 : index
    %28 = vector.load %arg5[%c0_13, %c0_14] : memref<1x128xf32, #tpu.memory_space<vmem>>, vector<1x128xf32>
    tpu.vector_store %arg5[%c0_13, %c0_14], %27 {strides = array<i32>} : memref<1x128xf32, #tpu.memory_space<vmem>>, vector<1x128xf32>,
    return
  }
  func.func @transform_0(%arg0: i32) -> (i32, i32) {
    %c0_i32 = arith.constant 0 : i32
    %c0_i32_0 = arith.constant 0 : i32
    return %arg0, %c0_i32 : i32, i32
  }
  func.func @transform_1(%arg0: i32) -> (i32, i32) {
    %c0_i32 = arith.constant 0 : i32
    %c0_i32_0 = arith.constant 0 : i32
    return %arg0, %c0_i32 : i32, i32
  }
  func.func @transform_2(%arg0: i32) -> (i32, i32) {
    %c0_i32 = arith.constant 0 : i32
    %c0_i32_0 = arith.constant 0 : i32
    %c0_i32_1 = arith.constant 0 : i32
    return %c0_i32, %c0_i32_0 : i32, i32
  }
  func.func @transform_3(%arg0: i32) -> i32 {
    %c0_i32 = arith.constant 0 : i32
    %c0_i32_0 = arith.constant 0 : i32
    return %c0_i32 : i32
  }
  func.func @transform_4(%arg0: i32) -> (i32, i32) {
    %c0_i32 = arith.constant 0 : i32
    %c0_i32_0 = arith.constant 0 : i32
    return %arg0, %c0_i32 : i32, i32
  }
}

</mosaic_0001>

<bundles_post_ra>
// kernel: squeeze.9
= control target key start
LH: loop header
LB: loop body
LE: loop exit
PB: predicated region body
PF: predicated region fallthrough
CT: control target
= control target key end

     0   :  { %vm7_vm0 = vcmask 130048   ;;  %vm13_vm1 = vcmask 261248   ;;  %s39_s0 = inlined_call_operand.vmem [shape: f32[2,16], index: 0, kind: input, shape index: {}]   ;;  %s40_s1 = inlined_call_operand.vmem [shape: f32[1,32], index: 1, kind: output, shape index: {}]  }
   0x1   :  { %v4_v0 = vld [vmem:[%s39_s0] sm:$0x3]  ;;  %s22_s0 = smov 16  }
   0x2   :  { %5 = vst [vmem:[#allocation1] sm:$0x3] %v4_v0 }
   0x9   :  { %v10_v1 = vld [vmem:[#allocation1 + $0x1] sm:$0x1]   ;;  %v6_v2 = vld [vmem:[#allocation1] sm:$0x1]  }
   0xa   :  { %11 = vrot.lane.b32.xlu0 %v10_v1, %s22_s0  ;;  %8 = vst.msk [vmem:[#allocation0] sm:$0x1] %vm7_vm0, %v6_v2  }
  0x7c   :  { %v12_v3 = vpop.permute.xlu0 %11  }
  0x7d   :  { %14 = vst.msk [vmem:[#allocation0] sm:$0x1] %vm13_vm1, %v12_v3  }
  0x84   :  { %v17_v4 = vld [vmem:[#allocation0] sm:$0x1] }
  0x85   :  { %20 = vst [vmem:[%s40_s1] sm:$0x1] %v17_v4 }

// kernel: concat_conv.1
= control target key start
LH: loop header
LB: loop body
LE: loop exit
PB: predicated region body
PF: predicated region fallthrough
CT: control target
= control target key end

     0   :  { %9 = vsyncpa [#allocation3], 0  ;;  %s87_s18 = smov [#allocation2]   ;;  %s139_s0 = inlined_call_operand.vmem [shape: f32[1,128], index: 0, kind: input, shape index: {}]   ;;  %s140_s1 = inlined_call_operand.vmem [shape: f32[1,128], index: 1, kind: input, shape index: {}]   ;;  %s141_s2 = inlined_call_operand.vmem [shape: f32[4,128], index: 2, kind: input, shape index: {}]   ;;  %s142_s3 = inlined_call_operand.vmem [shape: f32[3], index: 3, kind: input, shape index: {}]   ;;  %s143_s4 = inlined_call_operand.vmem [shape: f32[1,128], index: 4, kind: output, shape index: {}]  }
   0x1   :  { %s21_s17 = sshll.u32 %s142_s3, 4  ;;  %s22_s17 = int_to_ptr.vmem [resolvable:$true] %s21_s17 }
   0x2   :  { %24 = dma.vmem_to_smem %s22_s17, 16, %s87_s18, [#allocation3]  }
   0x3   :  { %85 = dma.done.wait [#allocation3], 16  }
   0x4   :  { %86 = vsyncadd [#allocation3], 4294967280 }
   0x5   :  { %29 = sfence }
   0x6   :  { %v30_v0 = vld [vmem:[%s139_s0] sm:$0x1]  ;;  %s88_s21 = smov 1   ;;  %s89_s22 = smov 127   ;;  %v49_v13 = vld [vmem:[%s141_s2 + $0x1] sm:$0x1] }
   0x7   :  { %42 = vrot.lane.b32.xlu0 %v30_v0, %s88_s21  ;;  %52 = vrot.lane.b32.xlu1 %v30_v0, %s89_s22  ;;  %v31_v1 = vld [vmem:[%s140_s1] sm:$0x1]  ;;  %s68_s3 = sld [smem:[#allocation2 + $0x1]]  ;;  %v54_v14 = vld [vmem:[%s141_s2 + $0x2] sm:$0x1] }
   0x8   :  { %s32_s25 = sld [smem:[#allocation2]]  ;;  %v44_v11 = vld [vmem:[%s141_s2] sm:$0x1]  ;;  %v59_v16 = vld [vmem:[%s141_s2 + $0x3] sm:$0x1] }
   0x9   :  { %s69_s26 = sld [smem:[#allocation2 + $0x2]] }
   0xd   :  { %v37_v2 = vstv %s68_s3 }
   0xe   :  { %v38_v3 = vmul.f32 %v37_v2, %v31_v1  ;;  %v35_v4 = vstv %s32_s25 }
   0xf   :  { %47 = vrot.lane.b32.xlu0 %v31_v1, %s88_s21  ;;  %57 = vrot.lane.b32.xlu1 %v31_v1, %s89_s22  ;;  %v39_v5 = vstv %s69_s26  ;;  %v36_v6 = vmul.f32 %v35_v4, %v30_v0 }
  0x10   :  { %v40_v7 = vadd.f32 %v39_v5, %v38_v3 }
  0x12   :  { %v41_v8 = vadd.f32 %v40_v7, %v36_v6 }
  0x79   :  { %v43_v9 = vpop.permute.xlu0 %42  ;;  %v53_v10 = vpop.permute.xlu1 %52 }
  0x7a   :  { %v45_v12 = vmul.f32 %v44_v11, %v43_v9  ;;  %v55_v20 = vmul.f32 %v54_v14, %v53_v10 }
  0x7c   :  { %v46_v17 = vadd.f32 %v45_v12, %v41_v8 }
  0x81   :  { %v48_v15 = vpop.permute.xlu0 %47  ;;  %v58_v19 = vpop.permute.xlu1 %57 }
  0x82   :  { %v50_v18 = vmul.f32 %v49_v13, %v48_v15  ;;  %v60_v22 = vmul.f32 %v59_v16, %v58_v19 }
  0x84   :  { %v51_v21 = vadd.f32 %v50_v18, %v46_v17 }
  0x86   :  { %v56_v23 = vadd.f32 %v55_v20, %v51_v21 }
  0x88   :  { %v61_v24 = vadd.f32 %v60_v22, %v56_v23 }
  0x8a   :  { %62 = vst [vmem:[%s143_s4] sm:$0x1] %v61_v24 }
  0x8b   :  { %67 = vsyncpa [#allocation3], 1 }

</bundles_post_ra>
